<compile_context>
chip_gen: v7x
topology: tpu7x:2x2x1
jax: 0.10.0
libtpu: 0.0.40
codegen_flags: <defaults>
</compile_context>

<pallas_src>
import functools

import jax
import jax.numpy as jnp
from jax.experimental import pallas as pl
from jax.experimental.pallas import tpu as pltpu

# kanachan constants (synthetic reproduction)
NUM_TYPES_OF_ACTIONS = 224
MAX_NUM_ACTION_CANDIDATES = 32


def _round_up(x: int, m: int) -> int:
    return (x + m - 1) // m * m


def _value_decoder_kernel(x_ref, w1_ref, b1_ref, w2_ref, b2_ref, out_ref, *,
                          activation: str):
    """One batch tile, batch on lanes.

    x_ref:   (Dp, TB)  gathered encoder rows, transposed (batch on lanes)
    w1_ref:  (Fp, Dp)  first Linear weight (PyTorch (out,in) layout, zero-padded)
    b1_ref:  (Fp, 1)   first Linear bias (column)
    w2_ref:  (Fp, 1)   final Linear weight as a column (zero-padded)
    b2_ref:  (1, 1)    final Linear bias, SMEM scalar
    out_ref: (1, TB)   lane-dense output row
    """
    x = x_ref[...]                                                       # (Dp, TB)
    h = jnp.dot(w1_ref[...], x, preferred_element_type=jnp.float32)     # (Fp, TB) MXU
    h = h + b1_ref[...]                                                  # bcast over lanes
    if activation == 'relu':
        h = jnp.maximum(h, 0.0)
    else:  # 'gelu' — PyTorch nn.GELU default is the exact (erf) formulation
        h = 0.5 * h * (1.0 + jax.lax.erf(h * 0.7071067811865476))
    # nn.Dropout is identity in eval mode (inference forward semantics).
    # Final Linear(F -> 1): VPU multiply + sublane reduction instead of a single-column
    # MXU matmul (avoids wasting 127/128 of the MXU and one MXU drain).
    y = jnp.sum(h * w2_ref[...], axis=0, keepdims=True)                 # (1, TB)
    out_ref[...] = (y + b2_ref[0, 0]).astype(out_ref.dtype)


@functools.partial(jax.jit, static_argnames=('activation', 'batch_tile'))
def value_decoder_forward(candidates, encode, params, *, activation='relu',
                          batch_tile=128):
    """candidates: (B, MAX_NUM_ACTION_CANDIDATES) int32; encode: (B, S, D) f32.

    params are in PyTorch nn.Linear layout:
      w1: (F, D), b1: (F,), w2: (1, F), b2: (1,)
    """
    w1, b1, w2, b2 = params
    B = encode.shape[0]
    D = encode.shape[-1]
    F = w1.shape[0]

    # --- glue: torch.nonzero(candidates == NUM_TYPES_OF_ACTIONS) + row gather ---
    # Upstream guarantees exactly one match per row -> argmax gives the column.
    enc_tail = encode[:, -MAX_NUM_ACTION_CANDIDATES:]                          # (B, A, D)
    pos = jnp.argmax(candidates == NUM_TYPES_OF_ACTIONS, axis=1)               # (B,)
    gathered = jnp.take_along_axis(enc_tail, pos[:, None, None], axis=1)[:, 0, :]  # (B, D)
    # TODO(synk): fuse this gather into the kernel (scalar-prefetched `pos` + manual
    # per-row DMA from HBM); kept as XLA glue since a blocked in-kernel one-hot gather
    # would read MAX_NUM_ACTION_CANDIDATES x more HBM bytes.

    # --- pad to TPU-friendly shapes ---
    TB = batch_tile
    Bp = _round_up(B, TB)                   # batch -> lanes, multiple of 128
    Dp = _round_up(D, 128)                  # MXU contraction / lane-dense weights
    Fp = _round_up(F, 8)                    # sublane-aligned hidden dim

    x_t = jnp.zeros((Dp, Bp), jnp.float32).at[:D, :B].set(
        gathered.astype(jnp.float32).T)                                        # (Dp, Bp)
    w1p = jnp.zeros((Fp, Dp), jnp.float32).at[:F, :D].set(w1.astype(jnp.float32))
    b1p = jnp.zeros((Fp, 1), jnp.float32).at[:F, 0].set(b1.astype(jnp.float32))
    w2p = jnp.zeros((Fp, 1), jnp.float32).at[:F, 0].set(
        w2.reshape(F).astype(jnp.float32))
    b2p = b2.reshape(1, 1).astype(jnp.float32)

    num_tiles = Bp // TB

    # VMEM budget: double-buffered x/out/weights + (Fp, TB) intermediate, with headroom.
    vmem_bytes = 4 * (2 * Dp * TB + 2 * Fp * Dp + 4 * Fp + 2 * TB + 2 * Fp * TB)
    vmem_limit = min(max(int(vmem_bytes * 1.5) + (4 << 20), 16 << 20), 64 << 20)

    kernel = functools.partial(_value_decoder_kernel, activation=activation)

    out = pl.pallas_call(
        kernel,
        out_shape=jax.ShapeDtypeStruct((1, Bp), jnp.float32),
        grid_spec=pltpu.PrefetchScalarGridSpec(
            num_scalar_prefetch=0,
            grid=(num_tiles,),
            in_specs=[
                pl.BlockSpec((Dp, TB), lambda i: (0, i)),    # activations (batch tiled)
                pl.BlockSpec((Fp, Dp), lambda i: (0, 0)),    # W1 (resident, copied once)
                pl.BlockSpec((Fp, 1), lambda i: (0, 0)),     # b1
                pl.BlockSpec((Fp, 1), lambda i: (0, 0)),     # w2 column
                pl.BlockSpec(memory_space=pltpu.MemorySpace.SMEM),  # b2 scalar
            ],
            out_specs=pl.BlockSpec((1, TB), lambda i: (0, i)),      # lane-dense output
        ),
        compiler_params=pltpu.CompilerParams(
            dimension_semantics=("parallel",),
            vmem_limit_bytes=vmem_limit,
        ),
    )(x_t, w1p, b1p, w2p, b2p)

    return out[0, :B]   # torch.squeeze(prediction, dim=1) -> (B,)


def init_params(key, dimension, dim_final_feedforward):
    """Deterministic synthetic init, PyTorch nn.Linear layouts."""
    k1, k2, k3, k4 = jax.random.split(key, 4)
    s1 = 1.0 / jnp.sqrt(dimension)
    s2 = 1.0 / jnp.sqrt(dim_final_feedforward)
    w1 = jax.random.uniform(k1, (dim_final_feedforward, dimension),
                            jnp.float32, -s1, s1)
    b1 = jax.random.uniform(k2, (dim_final_feedforward,), jnp.float32, -s1, s1)
    w2 = jax.random.uniform(k3, (1, dim_final_feedforward), jnp.float32, -s2, s2)
    b2 = jax.random.uniform(k4, (1,), jnp.float32, -s2, s2)
    return w1, b1, w2, b2


if __name__ == "__main__":
    key = jax.random.PRNGKey(0)
    B, S = 8, 48                       # S > MAX_NUM_ACTION_CANDIDATES
    dimension, dim_final_feedforward = 32, 64
    k_enc, k_pos, k_cand, k_par = jax.random.split(key, 4)

    encode = jax.random.normal(k_enc, (B, S, dimension), jnp.float32)
    # candidates: one <VALUE> marker (== NUM_TYPES_OF_ACTIONS) per row.
    pos = jax.random.randint(k_pos, (B,), 0, MAX_NUM_ACTION_CANDIDATES)
    candidates = jax.random.randint(k_cand, (B, MAX_NUM_ACTION_CANDIDATES),
                                    0, NUM_TYPES_OF_ACTIONS, jnp.int32)
    candidates = candidates.at[jnp.arange(B), pos].set(NUM_TYPES_OF_ACTIONS)

    params = init_params(k_par, dimension, dim_final_feedforward)

    out = value_decoder_forward(candidates, encode, params, activation='relu')
    out = jax.block_until_ready(out)
    assert out.shape == (B,), out.shape

    # silent correctness check against a pure-JAX reference (PyTorch layouts)
    w1, b1, w2, b2 = params
    enc_tail = encode[:, -MAX_NUM_ACTION_CANDIDATES:]
    g = jnp.take_along_axis(
        enc_tail,
        jnp.argmax(candidates == NUM_TYPES_OF_ACTIONS, axis=1)[:, None, None],
        axis=1)[:, 0, :]
    ref = (jnp.maximum(g @ w1.T + b1, 0.0) @ w2.T + b2)[:, 0]
    assert jnp.allclose(out, ref, atol=1e-5, rtol=1e-5), (out, ref)

    print("KERNEL_OK")
</pallas_src>

<mosaic_0001>
module attributes {stable_mosaic.version = 11 : i64} {
  func.func @_value_decoder_kernel(%arg0: i32, %arg1: memref<128x128xf32, #tpu.memory_space<vmem>>, %arg2: memref<64x128xf32, #tpu.memory_space<vmem>>, %arg3: memref<64x1xf32, #tpu.memory_space<vmem>>, %arg4: memref<64x1xf32, #tpu.memory_space<vmem>>, %arg5: memref<1x1xf32, #tpu.memory_space<smem>>, %arg6: memref<1x128xf32, #tpu.memory_space<vmem>>) attributes {dimension_semantics = [#tpu.dimension_semantics<parallel>], iteration_bounds = array<i64: 1>, scalar_prefetch = 0 : i64, scratch_operands = 0 : i64, tpu.core_type = #tpu.core_type<tc>, window_params = [{transform_indices = @transform_0, window_bounds = array<i64: 128, 128>}, {pipeline_mode = #tpu.pipeline_mode<synchronous>, transform_indices = @transform_1, window_bounds = array<i64: 64, 128>}, {pipeline_mode = #tpu.pipeline_mode<synchronous>, transform_indices = @transform_2, window_bounds = array<i64: 64, 1>}, {pipeline_mode = #tpu.pipeline_mode<synchronous>, transform_indices = @transform_3, window_bounds = array<i64: 64, 1>}, {transform_indices = @transform_4, window_bounds = array<i64: 1, 1>}, {transform_indices = @transform_5, window_bounds = array<i64: 1, 128>}]} {
    %c0 = arith.constant 0 : index
    %c0_0 = arith.constant 0 : index
    %0 = vector.load %arg1[%c0, %c0_0] : memref<128x128xf32, #tpu.memory_space<vmem>>, vector<128x128xf32>
    %c0_1 = arith.constant 0 : index
    %c0_2 = arith.constant 0 : index
    %1 = vector.load %arg2[%c0_1, %c0_2] : memref<64x128xf32, #tpu.memory_space<vmem>>, vector<64x128xf32>
    %cst = arith.constant dense<0.000000e+00> : vector<64x128xf32>
    %2 = tpu.matmul %1, %0, %cst {dimension_numbers = #tpu.dot_dimension_numbers<[1], [0], [0], [1], [0, 0, 1, 1], [], []>} : vector<64x128xf32>, vector<128x128xf32>, vector<64x128xf32> -> vector<64x128xf32>
    %c0_3 = arith.constant 0 : index
    %c0_4 = arith.constant 0 : index
    %3 = vector.load %arg3[%c0_3, %c0_4] : memref<64x1xf32, #tpu.memory_space<vmem>>, vector<64x1xf32>
    %4 = vector.broadcast %3 : vector<64x1xf32> to vector<64x128xf32>
    %5 = arith.addf %2, %4 : vector<64x128xf32>
    %cst_5 = arith.constant 0.000000e+00 : f32
    %6 = vector.broadcast %cst_5 : f32 to vector<64x128xf32>
    %7 = arith.maximumf %5, %6 : vector<64x128xf32>
    %c0_6 = arith.constant 0 : index
    %c0_7 = arith.constant 0 : index
    %8 = vector.load %arg4[%c0_6, %c0_7] : memref<64x1xf32, #tpu.memory_space<vmem>>, vector<64x1xf32>
    %9 = vector.broadcast %8 : vector<64x1xf32> to vector<64x128xf32>
    %10 = arith.mulf %7, %9 : vector<64x128xf32>
    %cst_8 = arith.constant dense<0.000000e+00> : vector<128xf32>
    %11 = vector.multi_reduction <add>, %10, %cst_8 [0] : vector<64x128xf32> to vector<128xf32>
    %12 = vector.shape_cast %11 : vector<128xf32> to vector<1x128xf32>
    %c0_9 = arith.constant 0 : index
    %c0_10 = arith.constant 0 : index
    %13 = memref.load %arg5[%c0_9, %c0_10] : memref<1x1xf32, #tpu.memory_space<smem>>
    %14 = vector.broadcast %13 : f32 to vector<1x128xf32>
    %15 = arith.addf %12, %14 : vector<1x128xf32>
    %c0_11 = arith.constant 0 : index
    %c0_12 = arith.constant 0 : index
    %16 = vector.load %arg6[%c0_11, %c0_12] : memref<1x128xf32, #tpu.memory_space<vmem>>, vector<1x128xf32>
    tpu.vector_store %arg6[%c0_11, %c0_12], %15 {strides = array<i32>} : memref<1x128xf32, #tpu.memory_space<vmem>>, vector<1x128xf32>,
    return
  }
  func.func @transform_0(%arg0: i32) -> (i32, i32) {
    %c0_i32 = arith.constant 0 : i32
    %c0_i32_0 = arith.constant 0 : i32
    return %c0_i32, %arg0 : i32, i32
  }
  func.func @transform_1(%arg0: i32) -> (i32, i32) {
    %c0_i32 = arith.constant 0 : i32
    %c0_i32_0 = arith.constant 0 : i32
    %c0_i32_1 = arith.constant 0 : i32
    return %c0_i32, %c0_i32_0 : i32, i32
  }
  func.func @transform_2(%arg0: i32) -> (i32, i32) {
    %c0_i32 = arith.constant 0 : i32
    %c0_i32_0 = arith.constant 0 : i32
    %c0_i32_1 = arith.constant 0 : i32
    return %c0_i32, %c0_i32_0 : i32, i32
  }
  func.func @transform_3(%arg0: i32) -> (i32, i32) {
    %c0_i32 = arith.constant 0 : i32
    %c0_i32_0 = arith.constant 0 : i32
    %c0_i32_1 = arith.constant 0 : i32
    return %c0_i32, %c0_i32_0 : i32, i32
  }
  func.func @transform_4(%arg0: i32) -> (i32, i32) {
    %c0_i32 = arith.constant 0 : i32
    %c0_i32_0 = arith.constant 0 : i32
    %c0_i32_1 = arith.constant 0 : i32
    return %c0_i32, %c0_i32_0 : i32, i32
  }
  func.func @transform_5(%arg0: i32) -> (i32, i32) {
    %c0_i32 = arith.constant 0 : i32
    %c0_i32_0 = arith.constant 0 : i32
    return %c0_i32, %arg0 : i32, i32
  }
}

</mosaic_0001>

<bundles_post_ra>
// kernel: value_decoder_forward.1
= control target key start
LH: loop header
LB: loop body
LE: loop exit
PB: predicated region body
PF: predicated region fallthrough
CT: control target
= control target key end

     0   :  { %v402_v3 = vmov 0   ;;  %s559_s0 = inlined_call_operand.vmem [shape: f32[128,128], index: 0, kind: input, shape index: {}]   ;;  %s560_s1 = inlined_call_operand.vmem [shape: f32[64,128], index: 1, kind: input, shape index: {}]   ;;  %s561_s2 = inlined_call_operand.vmem [shape: f32[64,1], index: 2, kind: input, shape index: {}]   ;;  %s562_s3 = inlined_call_operand.vmem [shape: f32[64,1], index: 3, kind: input, shape index: {}]   ;;  %s563_s4 = inlined_call_operand.<no memory space> [shape: f32[1,1], index: 4, kind: input, shape index: {}]   ;;  %s564_s5 = inlined_call_operand.vmem [shape: f32[1,128], index: 5, kind: output, shape index: {}]  }
   0x1   :  { %v21_v0 = vld [vmem:[%s559_s0] sm:$0xff]  ;;  %v22_v1 = vld [vmem:[%s559_s0 + $0x8] sm:$0xff]  ;;  %v23_v2 = vld [vmem:[%s559_s0 + $0x10] sm:$0xff]  ;;  %400 = vset.pattern.permute.xlu0 %v402_v3  ;;  %401 = vset.pattern.permute.xlu1 %v402_v3 }
   0x2   :  { %v351_v4 = vpack.c.bf16 %v22_v1, %v21_v0  ;;  %v24_v5 = vld [vmem:[%s559_s0 + $0x18] sm:$0xff]  ;;  %v25_v7 = vld [vmem:[%s559_s0 + $0x20] sm:$0xff]  ;;  %v26_v8 = vld [vmem:[%s559_s0 + $0x28] sm:$0xff] }
   0x3   :  { %v355_v6 = vpack.c.bf16 %v24_v5, %v23_v2  ;;  %v359_v9 = vpack.c.bf16 %v26_v8, %v25_v7  ;;  %v37_v10 = vld [vmem:[%s560_s1] sm:$0xff]  ;;  %v27_v12 = vld [vmem:[%s559_s0 + $0x30] sm:$0xff]  ;;  %v28_v13 = vld [vmem:[%s559_s0 + $0x38] sm:$0xff] }
   0x4   :  { %352 = vmatprep.subr.bf16.mxu0 %v351_v4  ;;  %383 = vmatprep.subr.bf16.mxu1 %v351_v4  ;;  %v41_v11 = vld [vmem:[%s560_s1 + $0x20] sm:$0xff]  ;;  %v47_v15 = vld [vmem:[%s561_s2 + $0x10] sm:$0xff]  ;;  %v363_v16 = vpack.c.bf16 %v28_v13, %v27_v12  ;;  %v30_v18 = vld [vmem:[%s559_s0 + $0x48] sm:$0xff] }
   0x5   :  { %354 = vmatpush3.bf16.msra.mxu0 %v351_v4  ;;  %391 = vmatpush3.bf16.msra.mxu1 %v351_v4  ;;  %v45_v14 = vld [vmem:[%s561_s2] sm:$0xff]  ;;  %v46_v19 = vld [vmem:[%s561_s2 + $0x8] sm:$0xff]  ;;  %v48_v20 = vld [vmem:[%s561_s2 + $0x18] sm:$0xff] }
   0x6   :  { %356 = vmatprep.subr.bf16.mxu0 %v355_v6  ;;  %384 = vmatprep.subr.bf16.mxu1 %v355_v6  ;;  %v29_v17 = vld [vmem:[%s559_s0 + $0x40] sm:$0xff]  ;;  %v31_v22 = vld [vmem:[%s559_s0 + $0x50] sm:$0xff]  ;;  %v32_v23 = vld [vmem:[%s559_s0 + $0x58] sm:$0xff] }
   0x7   :  { %339 = vmatprep.mubr.f32.mxu0 %v37_v10  ;;  %345 = vmatprep.mubr.f32.mxu1 %v41_v11  ;;  %v367_v21 = vpack.c.bf16 %v30_v18, %v29_v17  ;;  %v206_v24 = vld [vmem:[%s562_s3] sm:$0xff]  ;;  %v207_v25 = vld [vmem:[%s562_s3 + $0x8] sm:$0xff]  ;;  %v371_v26 = vpack.c.bf16 %v32_v23, %v31_v22  ;;  %v208_v30 = vld [vmem:[%s562_s3 + $0x10] sm:$0xff] }
   0x8   :  { %55 = vperm.xlu0 %400, %v45_v14   ;;  %65 = vperm.xlu1 %401, %v47_v15   ;;  %v33_v27 = vld [vmem:[%s559_s0 + $0x60] sm:$0xff]  ;;  %v34_v28 = vld [vmem:[%s559_s0 + $0x68] sm:$0xff]  ;;  %v35_v32 = vld [vmem:[%s559_s0 + $0x70] sm:$0xff] }
   0x9   :  { %358 = vmatpush3.bf16.msra.mxu0 %v355_v6  ;;  %392 = vmatpush3.bf16.msra.mxu1 %v355_v6  ;;  %v49_v29 = vld [vmem:[%s561_s2 + $0x20] sm:$0xff]  ;;  %v375_v31 = vpack.c.bf16 %v34_v28, %v33_v27  ;;  %v36_v33 = vld [vmem:[%s559_s0 + $0x78] sm:$0xff]  ;;  %v50_v34 = vld [vmem:[%s561_s2 + $0x28] sm:$0xff] }
   0xa   :  { %360 = vmatprep.subr.bf16.mxu0 %v359_v9  ;;  %385 = vmatprep.subr.bf16.mxu1 %v359_v9  ;;  %v209_v35 = vld [vmem:[%s562_s3 + $0x18] sm:$0xff]  ;;  %v379_v36 = vpack.c.bf16 %v36_v33, %v35_v32  ;;  %v51_v37 = vld [vmem:[%s561_s2 + $0x30] sm:$0xff]  ;;  %v210_v38 = vld [vmem:[%s562_s3 + $0x20] sm:$0xff] }
   0xb   :  { %v52_v39 = vld [vmem:[%s561_s2 + $0x38] sm:$0xff]  ;;  %v211_v40 = vld [vmem:[%s562_s3 + $0x28] sm:$0xff]  ;;  %v39_v43 = vld [vmem:[%s560_s1 + $0x10] sm:$0xff] }
   0xc   :  { %60 = vperm.xlu0 %400, %v46_v19   ;;  %70 = vperm.xlu1 %401, %v48_v20   ;;  %v38_v41 = vld [vmem:[%s560_s1 + $0x8] sm:$0xff]  ;;  %v43_v44 = vld [vmem:[%s560_s1 + $0x30] sm:$0xff]  ;;  %v213_v46 = vld [vmem:[%s562_s3 + $0x38] sm:$0xff] }
   0xd   :  { %362 = vmatpush3.bf16.msra.mxu0 %v359_v9  ;;  %393 = vmatpush3.bf16.msra.mxu1 %v359_v9  ;;  %v42_v42 = vld [vmem:[%s560_s1 + $0x28] sm:$0xff]  ;;  %v212_v45 = vld [vmem:[%s562_s3 + $0x30] sm:$0xff]  ;;  %v40_v47 = vld [vmem:[%s560_s1 + $0x18] sm:$0xff] }
   0xe   :  { %364 = vmatprep.subr.bf16.mxu0 %v363_v16  ;;  %386 = vmatprep.subr.bf16.mxu1 %v363_v16  ;;  %v44_v48 = vld [vmem:[%s560_s1 + $0x38] sm:$0xff] }
  0x10   :  { %216 = vperm.xlu0 %400, %v206_v24   ;;  %221 = vperm.xlu1 %401, %v207_v25  }
  0x11   :  { %366 = vmatpush3.bf16.msra.mxu0 %v363_v16  ;;  %394 = vmatpush3.bf16.msra.mxu1 %v363_v16 }
  0x12   :  { %368 = vmatprep.subr.bf16.mxu0 %v367_v21  ;;  %387 = vmatprep.subr.bf16.mxu1 %v367_v21 }
  0x14   :  { %75 = vperm.xlu0 %400, %v49_v29   ;;  %226 = vperm.xlu1 %401, %v208_v30  }
  0x15   :  { %370 = vmatpush3.bf16.msra.mxu0 %v367_v21  ;;  %395 = vmatpush3.bf16.msra.mxu1 %v367_v21 }
  0x16   :  { %372 = vmatprep.subr.bf16.mxu0 %v371_v26  ;;  %388 = vmatprep.subr.bf16.mxu1 %v371_v26 }
  0x18   :  { %80 = vperm.xlu0 %400, %v50_v34   ;;  %231 = vperm.xlu1 %401, %v209_v35  }
  0x19   :  { %374 = vmatpush3.bf16.msra.mxu0 %v371_v26  ;;  %396 = vmatpush3.bf16.msra.mxu1 %v371_v26 }
  0x1a   :  { %376 = vmatprep.subr.bf16.mxu0 %v375_v31  ;;  %389 = vmatprep.subr.bf16.mxu1 %v375_v31 }
  0x1c   :  { %85 = vperm.xlu0 %400, %v51_v37   ;;  %236 = vperm.xlu1 %401, %v210_v38  }
  0x1d   :  { %378 = vmatpush3.bf16.msra.mxu0 %v375_v31  ;;  %397 = vmatpush3.bf16.msra.mxu1 %v375_v31 }
  0x1e   :  { %380 = vmatprep.subr.bf16.mxu0 %v379_v36  ;;  %390 = vmatprep.subr.bf16.mxu1 %v379_v36 }
  0x20   :  { %90 = vperm.xlu0 %400, %v52_v39   ;;  %241 = vperm.xlu1 %401, %v211_v40  }
  0x21   :  { %382 = vmatpush3.bf16.msra.mxu0 %v379_v36  ;;  %398 = vmatpush3.bf16.msra.mxu1 %v379_v36 }
  0x24   :  { %340 = vmatmul.mubr.f32.vlgmr.msra.gmra.mrb[0].mxu0 %v38_v41  ;;  %346 = vmatmul.mubr.f32.vlgmr.msra.gmra.mrb[0].mxu1 %v42_v42 }
  0x25   :  { %342 = vmatprep.mubr.f32.mxu0 %v39_v43  ;;  %348 = vmatprep.mubr.f32.mxu1 %v43_v44 }
  0x26   :  { %246 = vperm.xlu0 %400, %v212_v45   ;;  %251 = vperm.xlu1 %401, %v213_v46   ;;  %v276_v45 = vstv %s563_s4 }
  0x28   :  { %343 = vmatmul.mubr.f32.gmra.mrb[2].mxu0 %v40_v47  ;;  %349 = vmatmul.mubr.f32.gmra.mrb[2].mxu1 %v44_v48 }
  0x87   :  { %v56_v49 = vpop.permute.xlu0 %55  ;;  %v66_v50 = vpop.permute.xlu1 %65 }
  0x8b   :  { %v61_v51 = vpop.permute.xlu0 %60  ;;  %v71_v52 = vpop.permute.xlu1 %70 }
  0x8f   :  { %v217_v53 = vpop.permute.xlu0 %216  ;;  %v222_v54 = vpop.permute.xlu1 %221 }
  0x93   :  { %v76_v55 = vpop.permute.xlu0 %75  ;;  %v227_v56 = vpop.permute.xlu1 %226 }
  0x97   :  { %v81_v57 = vpop.permute.xlu0 %80  ;;  %v232_v58 = vpop.permute.xlu1 %231 }
  0x9b   :  { %v86_v1 = vpop.permute.xlu0 %85  ;;  %v237_v13 = vpop.permute.xlu1 %236 }
  0x9f   :  { %v91_v21 = vpop.permute.xlu0 %90  ;;  %v242_v26 = vpop.permute.xlu1 %241 }
  0xa5   :  { %v247_v33 = vpop.permute.xlu0 %246  ;;  %v252_v36 = vpop.permute.xlu1 %251 }
  0xf7   :  { %v341_v59 = vpop.f32.mrb[0].mxu0  ;;  %v347_v60 = vpop.f32.mrb[0].mxu1 }
  0xf8   :  { %v165_v61 = vadd.f32 %v341_v59, %v61_v51  ;;  %v159_v62 = vpop.f32.mrb[1].mxu0  ;;  %v179_v63 = vpop.f32.mrb[1].mxu1  ;;  %v185_v14 = vadd.f32 %v347_v60, %v81_v57 }
  0xf9   :  { %v160_v0 = vadd.f32 %v159_v62, %v56_v49  ;;  %v180_v11 = vadd.f32 %v179_v63, %v76_v55 }
  0xfa   :  { %v199_v2 = vmax.f32 %v165_v61, 0.0  ;;  %v203_v22 = vmax.f32 %v185_v14, 0.0 }
  0xfb   :  { %v198_v3 = vmax.f32 %v160_v0, 0.0  ;;  %v344_v4 = vpop.f32.mrb[2].mxu0  ;;  %v350_v5 = vpop.f32.mrb[2].mxu1  ;;  %v202_v18 = vmax.f32 %v180_v11, 0.0 }
  0xfc   :  { %v255_v6 = vmul.f32 %v222_v54, %v199_v2  ;;  %v175_v7 = vadd.f32 %v344_v4, %v71_v52  ;;  %v169_v8 = vpop.f32.mrb[3].mxu0  ;;  %v189_v9 = vpop.f32.mrb[3].mxu1  ;;  %v195_v24 = vadd.f32 %v350_v5, %v91_v21  ;;  %v259_v30 = vmul.f32 %v242_v26, %v203_v22 }
  0xfd   :  { %v254_v10 = vmul.f32 %v217_v53, %v198_v3  ;;  %v170_v12 = vadd.f32 %v169_v8, %v66_v50  ;;  %v190_v20 = vadd.f32 %v189_v9, %v86_v1  ;;  %v258_v27 = vmul.f32 %v237_v13, %v202_v18 }
  0xfe   :  { %v201_v16 = vmax.f32 %v175_v7, 0.0  ;;  %v205_v31 = vmax.f32 %v195_v24, 0.0 }
  0xff   :  { %v262_v15 = vadd.f32 %v255_v6, %v254_v10  ;;  %v200_v17 = vmax.f32 %v170_v12, 0.0  ;;  %v204_v29 = vmax.f32 %v190_v20, 0.0 }
 0x100   :  { %v257_v23 = vmul.f32 %v232_v58, %v201_v16  ;;  %v261_v37 = vmul.f32 %v252_v36, %v205_v31 }
 0x101   :  { %v256_v19 = vmul.f32 %v227_v56, %v200_v17  ;;  %v260_v34 = vmul.f32 %v247_v33, %v204_v29 }
 0x103   :  { %v263_v25 = vadd.f32 %v262_v15, %v256_v19 }
 0x105   :  { %v264_v28 = vadd.f32 %v263_v25, %v257_v23 }
 0x107   :  { %v265_v32 = vadd.f32 %v264_v28, %v258_v27 }
 0x109   :  { %v266_v35 = vadd.f32 %v265_v32, %v259_v30 }
 0x10b   :  { %v267_v38 = vadd.f32 %v266_v35, %v260_v34 }
 0x10d   :  { %v268_v39 = vadd.f32 %v267_v38, %v261_v37 }
 0x10f   :  { %v269_v40 = vrot.slane %v268_v39, 4 }
 0x111   :  { %v270_v41 = vadd.f32 %v269_v40, %v268_v39 }
 0x113   :  { %v271_v42 = vrot.slane %v270_v41, 2 }
 0x115   :  { %v272_v43 = vadd.f32 %v271_v42, %v270_v41 }
 0x117   :  { %v273_v44 = vrot.slane %v272_v43, 1 }
 0x119   :  { %v274_v46 = vadd.f32 %v273_v44, %v272_v43 }
 0x11b   :  { %v277_v47 = vadd.f32 %v276_v45, %v274_v46 }
 0x11d   :  { %278 = vst [vmem:[%s564_s5] sm:$0x1] %v277_v47 }

</bundles_post_ra>
